<compile_context>
chip_gen: v7x
topology: tpu7x:2x2x1
jax: 0.10.0
libtpu: 0.0.40
codegen_flags: <defaults>
</compile_context>

<pallas_src>
import functools

import jax
import jax.numpy as jnp
import numpy as np
from jax.experimental import pallas as pl
from jax.experimental.pallas import tpu as pltpu


def lstm_decode_kernel(state_ref, w_gate_ref, w_outp_ref, out_ref, *,
                       max_length, C, H):
    B = state_ref.shape[1]

    # Load packed constants / initial state once; they stay in vregs across the
    # unrolled time loop (JAX does not CSE broadcasts, so hoist everything here).
    h = state_ref[0]             # [B, H]
    c = state_ref[1]             # [B, H]
    w_gate = w_gate_ref[...]     # [C+H+1, 4H]  rows: x-weights, h-weights, bias
    w_outp = w_outp_ref[...]     # [H+1,   C]   rows: h-weights, bias

    ones = jnp.ones((B, 1), jnp.float32)

    # SOS one-hot input (SOS = C - 2).
    col = jax.lax.broadcasted_iota(jnp.int32, (B, C), 1)
    x = jnp.where(col == C - 2, 1.0, 0.0).astype(jnp.float32)

    outs = []
    for _ in range(max_length):
        # One fused MXU op for all four gates, bias folded into the matmul.
        xh1 = jnp.concatenate([x, h, ones], axis=1)                  # [B, C+H+1]
        gates = jnp.dot(xh1, w_gate,
                        preferred_element_type=jnp.float32)          # [B, 4H]

        sig = jax.nn.sigmoid(gates)          # one EUP pass over the whole block
        i_g = sig[:, 0 * H:1 * H]
        f_g = sig[:, 1 * H:2 * H]
        g_g = jnp.tanh(gates[:, 2 * H:3 * H])
        o_g = sig[:, 3 * H:4 * H]

        c = f_g * c + i_g * g_g
        h = o_g * jnp.tanh(c)

        # output_label Linear (bias folded) + stabilized LogSoftmax(dim=1).
        h1 = jnp.concatenate([h, ones], axis=1)                      # [B, H+1]
        logits = jnp.dot(h1, w_outp,
                         preferred_element_type=jnp.float32)         # [B, C]
        m = jnp.max(logits, axis=1, keepdims=True)
        lse = m + jnp.log(jnp.sum(jnp.exp(logits - m), axis=1, keepdims=True))
        x = logits - lse                                             # fed back
        outs.append(x)

    # Lane-dense single writeback: [B, max_length*C] (= [2, 128] at these shapes).
    out_ref[...] = jnp.concatenate(outs, axis=1)


def text2bboxes_forward(caption_embedding, cell_init, params, max_length):
    """params: (w_ih [4H,C], w_hh [4H,H], b_ih [4H], b_hh [4H], w_out [C,H], b_out [C])
    Returns [max_length, B, C] of log-probabilities."""
    w_ih, w_hh, b_ih, b_hh, w_out, b_out = params
    B, H = caption_embedding.shape
    C = w_out.shape[0]

    # Host-side packing: one gate slab, one output-head slab, one stacked state.
    w_gate = jnp.concatenate([
        jnp.asarray(w_ih, jnp.float32).T,                          # [C, 4H]
        jnp.asarray(w_hh, jnp.float32).T,                          # [H, 4H]
        (b_ih + b_hh).reshape(1, 4 * H).astype(jnp.float32),       # [1, 4H]
    ], axis=0)                                                     # [C+H+1, 4H]

    w_outp = jnp.concatenate([
        jnp.asarray(w_out, jnp.float32).T,                         # [H, C]
        jnp.asarray(b_out, jnp.float32).reshape(1, C),             # [1, C]
    ], axis=0)                                                     # [H+1, C]

    state0 = jnp.stack([caption_embedding.astype(jnp.float32),
                        cell_init.astype(jnp.float32)], axis=0)    # [2, B, H]

    kernel = functools.partial(lstm_decode_kernel,
                               max_length=max_length, C=C, H=H)
    vmem = lambda: pl.BlockSpec(memory_space=pltpu.MemorySpace.VMEM)

    packed = pl.pallas_call(
        kernel,
        out_shape=jax.ShapeDtypeStruct((B, max_length * C), jnp.float32),
        in_specs=[vmem(), vmem(), vmem()],
        out_specs=vmem(),
    )(state0, w_gate, w_outp)

    # Pure layout plumbing outside the kernel: [B, T*C] -> [T, B, C].
    return jnp.transpose(packed.reshape(B, max_length, C), (1, 0, 2))


def reference_forward(caption_embedding, cell_init, params, max_length):
    """Pure-JAX reference mirroring the PyTorch forward."""
    w_ih, w_hh, b_ih, b_hh, w_out, b_out = params
    B, _ = caption_embedding.shape
    C = w_out.shape[0]
    h, c = caption_embedding, cell_init
    x = jnp.zeros((B, C), jnp.float32).at[:, C - 2].set(1.0)  # one-hot SOS
    outs = []
    for _ in range(max_length):
        gates = x @ w_ih.T + b_ih + h @ w_hh.T + b_hh
        i_g, f_g, g_g, o_g = jnp.split(gates, 4, axis=1)
        i_g, f_g = jax.nn.sigmoid(i_g), jax.nn.sigmoid(f_g)
        g_g, o_g = jnp.tanh(g_g), jax.nn.sigmoid(o_g)
        c = f_g * c + i_g * g_g
        h = o_g * jnp.tanh(c)
        x = jax.nn.log_softmax(h @ w_out.T + b_out, axis=1)
        outs.append(x)
    return jnp.stack(outs, 0)


if __name__ == "__main__":
    # labels dict with max value 15  ->  num_categories = 16, SOS = 14, EOS = 15
    num_categories = 16
    hidden_size = 32
    batch_size = 2     # note (perf): batch B >= 8 fills all f32 sublanes; kernel unchanged
    max_length = 8

    key = jax.random.PRNGKey(0)
    k_emb, k_cell, k1, k2, k3, k4, k5, k6 = jax.random.split(key, 8)

    bound = 1.0 / np.sqrt(hidden_size)  # PyTorch LSTMCell / Linear uniform init scale
    w_ih = jax.random.uniform(k1, (4 * hidden_size, num_categories), jnp.float32, -bound, bound)
    w_hh = jax.random.uniform(k2, (4 * hidden_size, hidden_size), jnp.float32, -bound, bound)
    b_ih = jax.random.uniform(k3, (4 * hidden_size,), jnp.float32, -bound, bound)
    b_hh = jax.random.uniform(k4, (4 * hidden_size,), jnp.float32, -bound, bound)
    w_out = jax.random.uniform(k5, (num_categories, hidden_size), jnp.float32, -bound, bound)
    b_out = jax.random.uniform(k6, (num_categories,), jnp.float32, -bound, bound)
    params = (w_ih, w_hh, b_ih, b_hh, w_out, b_out)

    caption_embedding = jax.random.normal(k_emb, (batch_size, hidden_size), jnp.float32)
    # TODO(synk): torch.randn_like(caption_embedding) in init_hidden_states is
    # replaced by a PRNG-seeded JAX normal (synthetic, deterministic here).
    cell_init = jax.random.normal(k_cell, (batch_size, hidden_size), jnp.float32)

    out = text2bboxes_forward(caption_embedding, cell_init, params, max_length)
    out = jax.block_until_ready(out)

    ref = reference_forward(caption_embedding, cell_init, params, max_length)
    np.testing.assert_allclose(np.asarray(out), np.asarray(ref), rtol=2e-3, atol=2e-3)

    assert out.shape == (max_length, batch_size, num_categories)
    print("KERNEL_OK")
</pallas_src>

<mosaic_0001>
module attributes {stable_mosaic.version = 11 : i64} {
  func.func @lstm_decode_kernel(%arg0: memref<2x2x32xf32, #tpu.memory_space<vmem>>, %arg1: memref<49x128xf32, #tpu.memory_space<vmem>>, %arg2: memref<33x16xf32, #tpu.memory_space<vmem>>, %arg3: memref<2x128xf32, #tpu.memory_space<vmem>>) attributes {dimension_semantics = [], scalar_prefetch = 0 : i64, scratch_operands = 0 : i64, tpu.core_type = #tpu.core_type<tc>} {
    %c0 = arith.constant 0 : index
    %c0_0 = arith.constant 0 : index
    %c0_1 = arith.constant 0 : index
    %0 = vector.load %arg0[%c0, %c0_0, %c0_1] : memref<2x2x32xf32, #tpu.memory_space<vmem>>, vector<1x2x32xf32>
    %1 = vector.shape_cast %0 : vector<1x2x32xf32> to vector<2x32xf32>
    %c1 = arith.constant 1 : index
    %c0_2 = arith.constant 0 : index
    %c0_3 = arith.constant 0 : index
    %2 = vector.load %arg0[%c1, %c0_2, %c0_3] : memref<2x2x32xf32, #tpu.memory_space<vmem>>, vector<1x2x32xf32>
    %3 = vector.shape_cast %2 : vector<1x2x32xf32> to vector<2x32xf32>
    %c0_4 = arith.constant 0 : index
    %c0_5 = arith.constant 0 : index
    %4 = vector.load %arg1[%c0_4, %c0_5] : memref<49x128xf32, #tpu.memory_space<vmem>>, vector<49x128xf32>
    %c0_6 = arith.constant 0 : index
    %c0_7 = arith.constant 0 : index
    %5 = vector.load %arg2[%c0_6, %c0_7] : memref<33x16xf32, #tpu.memory_space<vmem>>, vector<33x16xf32>
    %cst = arith.constant 1.000000e+00 : f32
    %6 = vector.broadcast %cst : f32 to vector<2x1xf32>
    %7 = tpu.iota {dimensions = array<i32: 1>} : vector<2x16xi32>
    %c14_i32 = arith.constant 14 : i32
    %8 = vector.broadcast %c14_i32 : i32 to vector<2x16xi32>
    %9 = arith.cmpi eq, %7, %8 : vector<2x16xi32>
    %cst_8 = arith.constant 1.000000e+00 : f32
    %cst_9 = arith.constant 0.000000e+00 : f32
    %10 = vector.broadcast %cst_8 : f32 to vector<2x16xf32>
    %11 = vector.broadcast %cst_9 : f32 to vector<2x16xf32>
    %12 = arith.select %9, %10, %11 : vector<2x16xi1>, vector<2x16xf32>
    %13 = tpu.concatenate %12, %1, %6 in 1 : vector<2x16xf32>, vector<2x32xf32>, vector<2x1xf32> -> vector<2x49xf32>
    %cst_10 = arith.constant dense<0.000000e+00> : vector<2x128xf32>
    %14 = tpu.matmul %13, %4, %cst_10 {dimension_numbers = #tpu.dot_dimension_numbers<[1], [0], [0], [1], [0, 0, 1, 1], [], []>} : vector<2x49xf32>, vector<49x128xf32>, vector<2x128xf32> -> vector<2x128xf32>
    %15 = arith.negf %14 : vector<2x128xf32>
    %16 = math.exp %15 : vector<2x128xf32>
    %cst_11 = arith.constant 1.000000e+00 : f32
    %17 = vector.broadcast %cst_11 : f32 to vector<2x128xf32>
    %18 = arith.addf %17, %16 : vector<2x128xf32>
    %19 = arith.divf %17, %18 : vector<2x128xf32>
    %20 = vector.extract_strided_slice %19 {offsets = [0, 0], sizes = [2, 32], strides = [1, 1]} : vector<2x128xf32> to vector<2x32xf32>
    %21 = vector.extract_strided_slice %19 {offsets = [0, 32], sizes = [2, 32], strides = [1, 1]} : vector<2x128xf32> to vector<2x32xf32>
    %22 = vector.extract_strided_slice %14 {offsets = [0, 64], sizes = [2, 32], strides = [1, 1]} : vector<2x128xf32> to vector<2x32xf32>
    %23 = math.tanh %22 : vector<2x32xf32>
    %24 = vector.extract_strided_slice %19 {offsets = [0, 96], sizes = [2, 32], strides = [1, 1]} : vector<2x128xf32> to vector<2x32xf32>
    %25 = arith.mulf %21, %3 : vector<2x32xf32>
    %26 = arith.mulf %20, %23 : vector<2x32xf32>
    %27 = arith.addf %25, %26 : vector<2x32xf32>
    %28 = math.tanh %27 : vector<2x32xf32>
    %29 = arith.mulf %24, %28 : vector<2x32xf32>
    %30 = tpu.concatenate %29, %6 in 1 : vector<2x32xf32>, vector<2x1xf32> -> vector<2x33xf32>
    %cst_12 = arith.constant dense<0.000000e+00> : vector<2x16xf32>
    %31 = tpu.matmul %30, %5, %cst_12 {dimension_numbers = #tpu.dot_dimension_numbers<[1], [0], [0], [1], [0, 0, 1, 1], [], []>} : vector<2x33xf32>, vector<33x16xf32>, vector<2x16xf32> -> vector<2x16xf32>
    %cst_13 = arith.constant dense<0xFF800000> : vector<2xf32>
    %32 = vector.multi_reduction <maximumf>, %31, %cst_13 [1] : vector<2x16xf32> to vector<2xf32>
    %33 = vector.shape_cast %32 : vector<2xf32> to vector<2x1xf32>
    %34 = vector.broadcast %33 : vector<2x1xf32> to vector<2x16xf32>
    %35 = arith.subf %31, %34 : vector<2x16xf32>
    %36 = math.exp %35 : vector<2x16xf32>
    %cst_14 = arith.constant dense<0.000000e+00> : vector<2xf32>
    %37 = vector.multi_reduction <add>, %36, %cst_14 [1] : vector<2x16xf32> to vector<2xf32>
    %38 = vector.shape_cast %37 : vector<2xf32> to vector<2x1xf32>
    %39 = math.log %38 : vector<2x1xf32>
    %40 = arith.addf %33, %39 : vector<2x1xf32>
    %41 = vector.broadcast %40 : vector<2x1xf32> to vector<2x16xf32>
    %42 = arith.subf %31, %41 : vector<2x16xf32>
    %43 = tpu.concatenate %42, %29, %6 in 1 : vector<2x16xf32>, vector<2x32xf32>, vector<2x1xf32> -> vector<2x49xf32>
    %cst_15 = arith.constant dense<0.000000e+00> : vector<2x128xf32>
    %44 = tpu.matmul %43, %4, %cst_15 {dimension_numbers = #tpu.dot_dimension_numbers<[1], [0], [0], [1], [0, 0, 1, 1], [], []>} : vector<2x49xf32>, vector<49x128xf32>, vector<2x128xf32> -> vector<2x128xf32>
    %45 = arith.negf %44 : vector<2x128xf32>
    %46 = math.exp %45 : vector<2x128xf32>
    %cst_16 = arith.constant 1.000000e+00 : f32
    %47 = vector.broadcast %cst_16 : f32 to vector<2x128xf32>
    %48 = arith.addf %47, %46 : vector<2x128xf32>
    %49 = arith.divf %47, %48 : vector<2x128xf32>
    %50 = vector.extract_strided_slice %49 {offsets = [0, 0], sizes = [2, 32], strides = [1, 1]} : vector<2x128xf32> to vector<2x32xf32>
    %51 = vector.extract_strided_slice %49 {offsets = [0, 32], sizes = [2, 32], strides = [1, 1]} : vector<2x128xf32> to vector<2x32xf32>
    %52 = vector.extract_strided_slice %44 {offsets = [0, 64], sizes = [2, 32], strides = [1, 1]} : vector<2x128xf32> to vector<2x32xf32>
    %53 = math.tanh %52 : vector<2x32xf32>
    %54 = vector.extract_strided_slice %49 {offsets = [0, 96], sizes = [2, 32], strides = [1, 1]} : vector<2x128xf32> to vector<2x32xf32>
    %55 = arith.mulf %51, %27 : vector<2x32xf32>
    %56 = arith.mulf %50, %53 : vector<2x32xf32>
    %57 = arith.addf %55, %56 : vector<2x32xf32>
    %58 = math.tanh %57 : vector<2x32xf32>
    %59 = arith.mulf %54, %58 : vector<2x32xf32>
    %60 = tpu.concatenate %59, %6 in 1 : vector<2x32xf32>, vector<2x1xf32> -> vector<2x33xf32>
    %cst_17 = arith.constant dense<0.000000e+00> : vector<2x16xf32>
    %61 = tpu.matmul %60, %5, %cst_17 {dimension_numbers = #tpu.dot_dimension_numbers<[1], [0], [0], [1], [0, 0, 1, 1], [], []>} : vector<2x33xf32>, vector<33x16xf32>, vector<2x16xf32> -> vector<2x16xf32>
    %cst_18 = arith.constant dense<0xFF800000> : vector<2xf32>
    %62 = vector.multi_reduction <maximumf>, %61, %cst_18 [1] : vector<2x16xf32> to vector<2xf32>
    %63 = vector.shape_cast %62 : vector<2xf32> to vector<2x1xf32>
    %64 = vector.broadcast %63 : vector<2x1xf32> to vector<2x16xf32>
    %65 = arith.subf %61, %64 : vector<2x16xf32>
    %66 = math.exp %65 : vector<2x16xf32>
    %cst_19 = arith.constant dense<0.000000e+00> : vector<2xf32>
    %67 = vector.multi_reduction <add>, %66, %cst_19 [1] : vector<2x16xf32> to vector<2xf32>
    %68 = vector.shape_cast %67 : vector<2xf32> to vector<2x1xf32>
    %69 = math.log %68 : vector<2x1xf32>
    %70 = arith.addf %63, %69 : vector<2x1xf32>
    %71 = vector.broadcast %70 : vector<2x1xf32> to vector<2x16xf32>
    %72 = arith.subf %61, %71 : vector<2x16xf32>
    %73 = tpu.concatenate %72, %59, %6 in 1 : vector<2x16xf32>, vector<2x32xf32>, vector<2x1xf32> -> vector<2x49xf32>
    %cst_20 = arith.constant dense<0.000000e+00> : vector<2x128xf32>
    %74 = tpu.matmul %73, %4, %cst_20 {dimension_numbers = #tpu.dot_dimension_numbers<[1], [0], [0], [1], [0, 0, 1, 1], [], []>} : vector<2x49xf32>, vector<49x128xf32>, vector<2x128xf32> -> vector<2x128xf32>
    %75 = arith.negf %74 : vector<2x128xf32>
    %76 = math.exp %75 : vector<2x128xf32>
    %cst_21 = arith.constant 1.000000e+00 : f32
    %77 = vector.broadcast %cst_21 : f32 to vector<2x128xf32>
    %78 = arith.addf %77, %76 : vector<2x128xf32>
    %79 = arith.divf %77, %78 : vector<2x128xf32>
    %80 = vector.extract_strided_slice %79 {offsets = [0, 0], sizes = [2, 32], strides = [1, 1]} : vector<2x128xf32> to vector<2x32xf32>
    %81 = vector.extract_strided_slice %79 {offsets = [0, 32], sizes = [2, 32], strides = [1, 1]} : vector<2x128xf32> to vector<2x32xf32>
    %82 = vector.extract_strided_slice %74 {offsets = [0, 64], sizes = [2, 32], strides = [1, 1]} : vector<2x128xf32> to vector<2x32xf32>
    %83 = math.tanh %82 : vector<2x32xf32>
    %84 = vector.extract_strided_slice %79 {offsets = [0, 96], sizes = [2, 32], strides = [1, 1]} : vector<2x128xf32> to vector<2x32xf32>
    %85 = arith.mulf %81, %57 : vector<2x32xf32>
    %86 = arith.mulf %80, %83 : vector<2x32xf32>
    %87 = arith.addf %85, %86 : vector<2x32xf32>
    %88 = math.tanh %87 : vector<2x32xf32>
    %89 = arith.mulf %84, %88 : vector<2x32xf32>
    %90 = tpu.concatenate %89, %6 in 1 : vector<2x32xf32>, vector<2x1xf32> -> vector<2x33xf32>
    %cst_22 = arith.constant dense<0.000000e+00> : vector<2x16xf32>
    %91 = tpu.matmul %90, %5, %cst_22 {dimension_numbers = #tpu.dot_dimension_numbers<[1], [0], [0], [1], [0, 0, 1, 1], [], []>} : vector<2x33xf32>, vector<33x16xf32>, vector<2x16xf32> -> vector<2x16xf32>
    %cst_23 = arith.constant dense<0xFF800000> : vector<2xf32>
    %92 = vector.multi_reduction <maximumf>, %91, %cst_23 [1] : vector<2x16xf32> to vector<2xf32>
    %93 = vector.shape_cast %92 : vector<2xf32> to vector<2x1xf32>
    %94 = vector.broadcast %93 : vector<2x1xf32> to vector<2x16xf32>
    %95 = arith.subf %91, %94 : vector<2x16xf32>
    %96 = math.exp %95 : vector<2x16xf32>
    %cst_24 = arith.constant dense<0.000000e+00> : vector<2xf32>
    %97 = vector.multi_reduction <add>, %96, %cst_24 [1] : vector<2x16xf32> to vector<2xf32>
    %98 = vector.shape_cast %97 : vector<2xf32> to vector<2x1xf32>
    %99 = math.log %98 : vector<2x1xf32>
    %100 = arith.addf %93, %99 : vector<2x1xf32>
    %101 = vector.broadcast %100 : vector<2x1xf32> to vector<2x16xf32>
    %102 = arith.subf %91, %101 : vector<2x16xf32>
    %103 = tpu.concatenate %102, %89, %6 in 1 : vector<2x16xf32>, vector<2x32xf32>, vector<2x1xf32> -> vector<2x49xf32>
    %cst_25 = arith.constant dense<0.000000e+00> : vector<2x128xf32>
    %104 = tpu.matmul %103, %4, %cst_25 {dimension_numbers = #tpu.dot_dimension_numbers<[1], [0], [0], [1], [0, 0, 1, 1], [], []>} : vector<2x49xf32>, vector<49x128xf32>, vector<2x128xf32> -> vector<2x128xf32>
    %105 = arith.negf %104 : vector<2x128xf32>
    %106 = math.exp %105 : vector<2x128xf32>
    %cst_26 = arith.constant 1.000000e+00 : f32
    %107 = vector.broadcast %cst_26 : f32 to vector<2x128xf32>
    %108 = arith.addf %107, %106 : vector<2x128xf32>
    %109 = arith.divf %107, %108 : vector<2x128xf32>
    %110 = vector.extract_strided_slice %109 {offsets = [0, 0], sizes = [2, 32], strides = [1, 1]} : vector<2x128xf32> to vector<2x32xf32>
    %111 = vector.extract_strided_slice %109 {offsets = [0, 32], sizes = [2, 32], strides = [1, 1]} : vector<2x128xf32> to vector<2x32xf32>
    %112 = vector.extract_strided_slice %104 {offsets = [0, 64], sizes = [2, 32], strides = [1, 1]} : vector<2x128xf32> to vector<2x32xf32>
    %113 = math.tanh %112 : vector<2x32xf32>
    %114 = vector.extract_strided_slice %109 {offsets = [0, 96], sizes = [2, 32], strides = [1, 1]} : vector<2x128xf32> to vector<2x32xf32>
    %115 = arith.mulf %111, %87 : vector<2x32xf32>
    %116 = arith.mulf %110, %113 : vector<2x32xf32>
    %117 = arith.addf %115, %116 : vector<2x32xf32>
    %118 = math.tanh %117 : vector<2x32xf32>
    %119 = arith.mulf %114, %118 : vector<2x32xf32>
    %120 = tpu.concatenate %119, %6 in 1 : vector<2x32xf32>, vector<2x1xf32> -> vector<2x33xf32>
    %cst_27 = arith.constant dense<0.000000e+00> : vector<2x16xf32>
    %121 = tpu.matmul %120, %5, %cst_27 {dimension_numbers = #tpu.dot_dimension_numbers<[1], [0], [0], [1], [0, 0, 1, 1], [], []>} : vector<2x33xf32>, vector<33x16xf32>, vector<2x16xf32> -> vector<2x16xf32>
    %cst_28 = arith.constant dense<0xFF800000> : vector<2xf32>
    %122 = vector.multi_reduction <maximumf>, %121, %cst_28 [1] : vector<2x16xf32> to vector<2xf32>
    %123 = vector.shape_cast %122 : vector<2xf32> to vector<2x1xf32>
    %124 = vector.broadcast %123 : vector<2x1xf32> to vector<2x16xf32>
    %125 = arith.subf %121, %124 : vector<2x16xf32>
    %126 = math.exp %125 : vector<2x16xf32>
    %cst_29 = arith.constant dense<0.000000e+00> : vector<2xf32>
    %127 = vector.multi_reduction <add>, %126, %cst_29 [1] : vector<2x16xf32> to vector<2xf32>
    %128 = vector.shape_cast %127 : vector<2xf32> to vector<2x1xf32>
    %129 = math.log %128 : vector<2x1xf32>
    %130 = arith.addf %123, %129 : vector<2x1xf32>
    %131 = vector.broadcast %130 : vector<2x1xf32> to vector<2x16xf32>
    %132 = arith.subf %121, %131 : vector<2x16xf32>
    %133 = tpu.concatenate %132, %119, %6 in 1 : vector<2x16xf32>, vector<2x32xf32>, vector<2x1xf32> -> vector<2x49xf32>
    %cst_30 = arith.constant dense<0.000000e+00> : vector<2x128xf32>
    %134 = tpu.matmul %133, %4, %cst_30 {dimension_numbers = #tpu.dot_dimension_numbers<[1], [0], [0], [1], [0, 0, 1, 1], [], []>} : vector<2x49xf32>, vector<49x128xf32>, vector<2x128xf32> -> vector<2x128xf32>
    %135 = arith.negf %134 : vector<2x128xf32>
    %136 = math.exp %135 : vector<2x128xf32>
    %cst_31 = arith.constant 1.000000e+00 : f32
    %137 = vector.broadcast %cst_31 : f32 to vector<2x128xf32>
    %138 = arith.addf %137, %136 : vector<2x128xf32>
    %139 = arith.divf %137, %138 : vector<2x128xf32>
    %140 = vector.extract_strided_slice %139 {offsets = [0, 0], sizes = [2, 32], strides = [1, 1]} : vector<2x128xf32> to vector<2x32xf32>
    %141 = vector.extract_strided_slice %139 {offsets = [0, 32], sizes = [2, 32], strides = [1, 1]} : vector<2x128xf32> to vector<2x32xf32>
    %142 = vector.extract_strided_slice %134 {offsets = [0, 64], sizes = [2, 32], strides = [1, 1]} : vector<2x128xf32> to vector<2x32xf32>
    %143 = math.tanh %142 : vector<2x32xf32>
    %144 = vector.extract_strided_slice %139 {offsets = [0, 96], sizes = [2, 32], strides = [1, 1]} : vector<2x128xf32> to vector<2x32xf32>
    %145 = arith.mulf %141, %117 : vector<2x32xf32>
    %146 = arith.mulf %140, %143 : vector<2x32xf32>
    %147 = arith.addf %145, %146 : vector<2x32xf32>
    %148 = math.tanh %147 : vector<2x32xf32>
    %149 = arith.mulf %144, %148 : vector<2x32xf32>
    %150 = tpu.concatenate %149, %6 in 1 : vector<2x32xf32>, vector<2x1xf32> -> vector<2x33xf32>
    %cst_32 = arith.constant dense<0.000000e+00> : vector<2x16xf32>
    %151 = tpu.matmul %150, %5, %cst_32 {dimension_numbers = #tpu.dot_dimension_numbers<[1], [0], [0], [1], [0, 0, 1, 1], [], []>} : vector<2x33xf32>, vector<33x16xf32>, vector<2x16xf32> -> vector<2x16xf32>
    %cst_33 = arith.constant dense<0xFF800000> : vector<2xf32>
    %152 = vector.multi_reduction <maximumf>, %151, %cst_33 [1] : vector<2x16xf32> to vector<2xf32>
    %153 = vector.shape_cast %152 : vector<2xf32> to vector<2x1xf32>
    %154 = vector.broadcast %153 : vector<2x1xf32> to vector<2x16xf32>
    %155 = arith.subf %151, %154 : vector<2x16xf32>
    %156 = math.exp %155 : vector<2x16xf32>
    %cst_34 = arith.constant dense<0.000000e+00> : vector<2xf32>
    %157 = vector.multi_reduction <add>, %156, %cst_34 [1] : vector<2x16xf32> to vector<2xf32>
    %158 = vector.shape_cast %157 : vector<2xf32> to vector<2x1xf32>
    %159 = math.log %158 : vector<2x1xf32>
    %160 = arith.addf %153, %159 : vector<2x1xf32>
    %161 = vector.broadcast %160 : vector<2x1xf32> to vector<2x16xf32>
    %162 = arith.subf %151, %161 : vector<2x16xf32>
    %163 = tpu.concatenate %162, %149, %6 in 1 : vector<2x16xf32>, vector<2x32xf32>, vector<2x1xf32> -> vector<2x49xf32>
    %cst_35 = arith.constant dense<0.000000e+00> : vector<2x128xf32>
    %164 = tpu.matmul %163, %4, %cst_35 {dimension_numbers = #tpu.dot_dimension_numbers<[1], [0], [0], [1], [0, 0, 1, 1], [], []>} : vector<2x49xf32>, vector<49x128xf32>, vector<2x128xf32> -> vector<2x128xf32>
    %165 = arith.negf %164 : vector<2x128xf32>
    %166 = math.exp %165 : vector<2x128xf32>
    %cst_36 = arith.constant 1.000000e+00 : f32
    %167 = vector.broadcast %cst_36 : f32 to vector<2x128xf32>
    %168 = arith.addf %167, %166 : vector<2x128xf32>
    %169 = arith.divf %167, %168 : vector<2x128xf32>
    %170 = vector.extract_strided_slice %169 {offsets = [0, 0], sizes = [2, 32], strides = [1, 1]} : vector<2x128xf32> to vector<2x32xf32>
    %171 = vector.extract_strided_slice %169 {offsets = [0, 32], sizes = [2, 32], strides = [1, 1]} : vector<2x128xf32> to vector<2x32xf32>
    %172 = vector.extract_strided_slice %164 {offsets = [0, 64], sizes = [2, 32], strides = [1, 1]} : vector<2x128xf32> to vector<2x32xf32>
    %173 = math.tanh %172 : vector<2x32xf32>
    %174 = vector.extract_strided_slice %169 {offsets = [0, 96], sizes = [2, 32], strides = [1, 1]} : vector<2x128xf32> to vector<2x32xf32>
    %175 = arith.mulf %171, %147 : vector<2x32xf32>
    %176 = arith.mulf %170, %173 : vector<2x32xf32>
    %177 = arith.addf %175, %176 : vector<2x32xf32>
    %178 = math.tanh %177 : vector<2x32xf32>
    %179 = arith.mulf %174, %178 : vector<2x32xf32>
    %180 = tpu.concatenate %179, %6 in 1 : vector<2x32xf32>, vector<2x1xf32> -> vector<2x33xf32>
    %cst_37 = arith.constant dense<0.000000e+00> : vector<2x16xf32>
    %181 = tpu.matmul %180, %5, %cst_37 {dimension_numbers = #tpu.dot_dimension_numbers<[1], [0], [0], [1], [0, 0, 1, 1], [], []>} : vector<2x33xf32>, vector<33x16xf32>, vector<2x16xf32> -> vector<2x16xf32>
    %cst_38 = arith.constant dense<0xFF800000> : vector<2xf32>
    %182 = vector.multi_reduction <maximumf>, %181, %cst_38 [1] : vector<2x16xf32> to vector<2xf32>
    %183 = vector.shape_cast %182 : vector<2xf32> to vector<2x1xf32>
    %184 = vector.broadcast %183 : vector<2x1xf32> to vector<2x16xf32>
    %185 = arith.subf %181, %184 : vector<2x16xf32>
    %186 = math.exp %185 : vector<2x16xf32>
    %cst_39 = arith.constant dense<0.000000e+00> : vector<2xf32>
    %187 = vector.multi_reduction <add>, %186, %cst_39 [1] : vector<2x16xf32> to vector<2xf32>
    %188 = vector.shape_cast %187 : vector<2xf32> to vector<2x1xf32>
    %189 = math.log %188 : vector<2x1xf32>
    %190 = arith.addf %183, %189 : vector<2x1xf32>
    %191 = vector.broadcast %190 : vector<2x1xf32> to vector<2x16xf32>
    %192 = arith.subf %181, %191 : vector<2x16xf32>
    %193 = tpu.concatenate %192, %179, %6 in 1 : vector<2x16xf32>, vector<2x32xf32>, vector<2x1xf32> -> vector<2x49xf32>
    %cst_40 = arith.constant dense<0.000000e+00> : vector<2x128xf32>
    %194 = tpu.matmul %193, %4, %cst_40 {dimension_numbers = #tpu.dot_dimension_numbers<[1], [0], [0], [1], [0, 0, 1, 1], [], []>} : vector<2x49xf32>, vector<49x128xf32>, vector<2x128xf32> -> vector<2x128xf32>
    %195 = arith.negf %194 : vector<2x128xf32>
    %196 = math.exp %195 : vector<2x128xf32>
    %cst_41 = arith.constant 1.000000e+00 : f32
    %197 = vector.broadcast %cst_41 : f32 to vector<2x128xf32>
    %198 = arith.addf %197, %196 : vector<2x128xf32>
    %199 = arith.divf %197, %198 : vector<2x128xf32>
    %200 = vector.extract_strided_slice %199 {offsets = [0, 0], sizes = [2, 32], strides = [1, 1]} : vector<2x128xf32> to vector<2x32xf32>
    %201 = vector.extract_strided_slice %199 {offsets = [0, 32], sizes = [2, 32], strides = [1, 1]} : vector<2x128xf32> to vector<2x32xf32>
    %202 = vector.extract_strided_slice %194 {offsets = [0, 64], sizes = [2, 32], strides = [1, 1]} : vector<2x128xf32> to vector<2x32xf32>
    %203 = math.tanh %202 : vector<2x32xf32>
    %204 = vector.extract_strided_slice %199 {offsets = [0, 96], sizes = [2, 32], strides = [1, 1]} : vector<2x128xf32> to vector<2x32xf32>
    %205 = arith.mulf %201, %177 : vector<2x32xf32>
    %206 = arith.mulf %200, %203 : vector<2x32xf32>
    %207 = arith.addf %205, %206 : vector<2x32xf32>
    %208 = math.tanh %207 : vector<2x32xf32>
    %209 = arith.mulf %204, %208 : vector<2x32xf32>
    %210 = tpu.concatenate %209, %6 in 1 : vector<2x32xf32>, vector<2x1xf32> -> vector<2x33xf32>
    %cst_42 = arith.constant dense<0.000000e+00> : vector<2x16xf32>
    %211 = tpu.matmul %210, %5, %cst_42 {dimension_numbers = #tpu.dot_dimension_numbers<[1], [0], [0], [1], [0, 0, 1, 1], [], []>} : vector<2x33xf32>, vector<33x16xf32>, vector<2x16xf32> -> vector<2x16xf32>
    %cst_43 = arith.constant dense<0xFF800000> : vector<2xf32>
    %212 = vector.multi_reduction <maximumf>, %211, %cst_43 [1] : vector<2x16xf32> to vector<2xf32>
    %213 = vector.shape_cast %212 : vector<2xf32> to vector<2x1xf32>
    %214 = vector.broadcast %213 : vector<2x1xf32> to vector<2x16xf32>
    %215 = arith.subf %211, %214 : vector<2x16xf32>
    %216 = math.exp %215 : vector<2x16xf32>
    %cst_44 = arith.constant dense<0.000000e+00> : vector<2xf32>
    %217 = vector.multi_reduction <add>, %216, %cst_44 [1] : vector<2x16xf32> to vector<2xf32>
    %218 = vector.shape_cast %217 : vector<2xf32> to vector<2x1xf32>
    %219 = math.log %218 : vector<2x1xf32>
    %220 = arith.addf %213, %219 : vector<2x1xf32>
    %221 = vector.broadcast %220 : vector<2x1xf32> to vector<2x16xf32>
    %222 = arith.subf %211, %221 : vector<2x16xf32>
    %223 = tpu.concatenate %222, %209, %6 in 1 : vector<2x16xf32>, vector<2x32xf32>, vector<2x1xf32> -> vector<2x49xf32>
    %cst_45 = arith.constant dense<0.000000e+00> : vector<2x128xf32>
    %224 = tpu.matmul %223, %4, %cst_45 {dimension_numbers = #tpu.dot_dimension_numbers<[1], [0], [0], [1], [0, 0, 1, 1], [], []>} : vector<2x49xf32>, vector<49x128xf32>, vector<2x128xf32> -> vector<2x128xf32>
    %225 = arith.negf %224 : vector<2x128xf32>
    %226 = math.exp %225 : vector<2x128xf32>
    %cst_46 = arith.constant 1.000000e+00 : f32
    %227 = vector.broadcast %cst_46 : f32 to vector<2x128xf32>
    %228 = arith.addf %227, %226 : vector<2x128xf32>
    %229 = arith.divf %227, %228 : vector<2x128xf32>
    %230 = vector.extract_strided_slice %229 {offsets = [0, 0], sizes = [2, 32], strides = [1, 1]} : vector<2x128xf32> to vector<2x32xf32>
    %231 = vector.extract_strided_slice %229 {offsets = [0, 32], sizes = [2, 32], strides = [1, 1]} : vector<2x128xf32> to vector<2x32xf32>
    %232 = vector.extract_strided_slice %224 {offsets = [0, 64], sizes = [2, 32], strides = [1, 1]} : vector<2x128xf32> to vector<2x32xf32>
    %233 = math.tanh %232 : vector<2x32xf32>
    %234 = vector.extract_strided_slice %229 {offsets = [0, 96], sizes = [2, 32], strides = [1, 1]} : vector<2x128xf32> to vector<2x32xf32>
    %235 = arith.mulf %231, %207 : vector<2x32xf32>
    %236 = arith.mulf %230, %233 : vector<2x32xf32>
    %237 = arith.addf %235, %236 : vector<2x32xf32>
    %238 = math.tanh %237 : vector<2x32xf32>
    %239 = arith.mulf %234, %238 : vector<2x32xf32>
    %240 = tpu.concatenate %239, %6 in 1 : vector<2x32xf32>, vector<2x1xf32> -> vector<2x33xf32>
    %cst_47 = arith.constant dense<0.000000e+00> : vector<2x16xf32>
    %241 = tpu.matmul %240, %5, %cst_47 {dimension_numbers = #tpu.dot_dimension_numbers<[1], [0], [0], [1], [0, 0, 1, 1], [], []>} : vector<2x33xf32>, vector<33x16xf32>, vector<2x16xf32> -> vector<2x16xf32>
    %cst_48 = arith.constant dense<0xFF800000> : vector<2xf32>
    %242 = vector.multi_reduction <maximumf>, %241, %cst_48 [1] : vector<2x16xf32> to vector<2xf32>
    %243 = vector.shape_cast %242 : vector<2xf32> to vector<2x1xf32>
    %244 = vector.broadcast %243 : vector<2x1xf32> to vector<2x16xf32>
    %245 = arith.subf %241, %244 : vector<2x16xf32>
    %246 = math.exp %245 : vector<2x16xf32>
    %cst_49 = arith.constant dense<0.000000e+00> : vector<2xf32>
    %247 = vector.multi_reduction <add>, %246, %cst_49 [1] : vector<2x16xf32> to vector<2xf32>
    %248 = vector.shape_cast %247 : vector<2xf32> to vector<2x1xf32>
    %249 = math.log %248 : vector<2x1xf32>
    %250 = arith.addf %243, %249 : vector<2x1xf32>
    %251 = vector.broadcast %250 : vector<2x1xf32> to vector<2x16xf32>
    %252 = arith.subf %241, %251 : vector<2x16xf32>
    %253 = tpu.concatenate %42, %72, %102, %132, %162, %192, %222, %252 in 1 : vector<2x16xf32>, vector<2x16xf32>, vector<2x16xf32>, vector<2x16xf32>, vector<2x16xf32>, vector<2x16xf32>, vector<2x16xf32>, vector<2x16xf32> -> vector<2x128xf32>
    %c0_50 = arith.constant 0 : index
    %c0_51 = arith.constant 0 : index
    %254 = vector.load %arg3[%c0_50, %c0_51] : memref<2x128xf32, #tpu.memory_space<vmem>>, vector<2x128xf32>
    tpu.vector_store %arg3[%c0_50, %c0_51], %253 {strides = array<i32>} : memref<2x128xf32, #tpu.memory_space<vmem>>, vector<2x128xf32>,
    return
  }
}

</mosaic_0001>

<bundles_post_ra>
// kernel: tpu_custom_call.1
= control target key start
LH: loop header
LB: loop body
LE: loop exit
PB: predicated region body
PF: predicated region fallthrough
CT: control target
= control target key end

     0   :  { %8 = vsyncpa [#allocation3], 0  ;;  %s2736_s0 = inlined_call_operand.hbm [shape: f32[2,2,32], index: 0, kind: input, shape index: {}]   ;;  %s2737_s1 = inlined_call_operand.vmem [shape: f32[49,128], index: 1, kind: input, shape index: {}]   ;;  %s2738_s2 = inlined_call_operand.vmem [shape: f32[33,16], index: 2, kind: input, shape index: {}]   ;;  %s2739_s3 = inlined_call_operand.hbm [shape: f32[2,128], index: 3, kind: output, shape index: {}]  }
   0x1   :  { %9 = vsyncpa [#allocation4], 0  ;;  %s2334_s12 = smov [#allocation2]   ;;  %s2286_s16 = scalar_lea.hbm %s2736_s0, 64 }
   0x2   :  { %s15_s13 = sshll.u32 %s2334_s12, 4  ;;  %p2287_p0 = scmp.ne.s32.totalorder %s2736_s0, %s2286_s16  ;;  %s16_s13 = int_to_ptr.vmem [resolvable:$true] %s15_s13 }
   0x3   :  { %p2290_p1 = scmp.lt.u32.totalorder %s2286_s16, %s2736_s0 }
   0x5   :  { %p2292_p2 = pnand %p2290_p1, %p2287_p0 }
   0x7   :  { %2295 = shalt.err (!%p2292_p2)
}
   0x8   :  { %s2296_s21 = scalar_lea.vmem %s16_s13, 64  ;;  %p2301_p4 = scmp.lt.s32.totalorder %s16_s13, %s16_s13 }
   0x9   :  { %p2297_p3 = scmp.ne.s32.totalorder %s16_s13, %s2296_s21  ;;  %p2302_p5 = scmp.lt.s32.totalorder %s2296_s21, %s2296_s21 }
   0xb   :  { %p2303_p6 = por %p2302_p5, %p2301_p4 }
   0xd   :  { %p2304_p7 = pnand %p2303_p6, %p2297_p3 }
   0xf   :  { %2307 = shalt.err (!%p2304_p7)
}
  0x10   :  { %s2335_s22 = smov 32   ;;  %s2336_s23 = smov 2  }
  0x11   :  { %21 = dma.hbm_to_vmem [thread:$0]  %s2736_s0, 64, %s16_s13, [#allocation3], %s2335_s22, %s2335_s22, %s2336_s23  }
  0x12   :  { %2330 = dma.done.wait [#allocation3], 64  }
  0x13   :  { %2331 = vsyncadd [#allocation3], 4294967232  ;;  %v2337_v0 = vmov 0.0|0.0   ;;  %vm2338_vm0 = vmmov 0   ;;  %v2339_v1 = vmov 0.0   ;;  %v32_v3 = vld [vmem:[%s2737_s1] sm:$0xff]  ;;  %v44_v14 = vlaneseq }
  0x14   :  { %2057 = vmatprep.subr.bf16.mxu0 %v2337_v0  ;;  %2066 = vmatprep.subr.bf16.mxu1 %v2337_v0  ;;  %v29_v2 = vld [vmem:[#allocation2] sm:$0x3]  ;;  %v33_v4 = vld [vmem:[%s2737_s1 + $0x8] sm:$0xff]  ;;  %s2340_s29 = smov 16   ;;  %v34_v6 = vld [vmem:[%s2737_s1 + $0x10] sm:$0xff]  ;;  %vm60_vm1 = vcmask 1040384  }
  0x15   :  { %1831 = vmatprep.mubr.msk.f32.mxu0 %vm2338_vm0, %v2339_v1  ;;  %1844 = vmatprep.mubr.msk.f32.mxu1 %vm2338_vm0, %v2339_v1  ;;  %v2394_v5 = vpack.c.bf16 %v33_v4, %v32_v3  ;;  %v35_v7 = vld [vmem:[%s2737_s1 + $0x18] sm:$0xff]  ;;  %v31_v8 = vld [vmem:[#allocation2 + $0x2] sm:$0x3]  ;;  %v37_v11 = vld [vmem:[%s2737_s1 + $0x28] sm:$0xff]  ;;  %v45_v15 = vand.u32 127, %v44_v14  ;;  %vm52_vm3 = vcmask 130048  }
  0x16   :  { %49 = vrot.lane.b32.xlu0 %v29_v2, %s2340_s29  ;;  %v2403_v9 = vpack.c.bf16 %v35_v7, %v34_v6  ;;  %142 = vrot.lane.b32.xlu1 %v31_v8, %s2335_s22  ;;  %v36_v10 = vld [vmem:[%s2737_s1 + $0x20] sm:$0xff]  ;;  %v2422_v13 = vld [vmem:[%s2737_s1 + $0x30] sm:$0x1]  ;;  %vm54_vm4 = vcmask 392192   ;;  %vm56_vm5 = vcmask 400384   ;;  %s2341_s1 = smov 64  }
  0x17   :  { %2059 = vmatpush3.bf16.msra.mxu0 %v2394_v5  ;;  %v2414_v12 = vpack.c.bf16 %v37_v11, %v36_v10  ;;  %vm46_vm2 = vcmp.eq.s32.totalorder %v45_v15, 14  ;;  %v39_v33 = vld [vmem:[%s2738_s2] sm:$0xff]  ;;  %v40_v34 = vld [vmem:[%s2738_s2 + $0x8] sm:$0xff]  ;;  %v41_v35 = vld [vmem:[%s2738_s2 + $0x10] sm:$0xff]  ;;  %vm166_vm6 = vcmask 261120   ;;  %vm168_vm7 = vcmask 269312  }
  0x18   :  { %2060 = vmatprep.subr.bf16.mxu0 %v2337_v0  ;;  %v47_v16 = vsel %vm46_vm2, 1.0, %v2339_v1  ;;  %v2447_v36 = vpack.c.bf16 %v40_v34, %v39_v33  ;;  %v42_v37 = vld [vmem:[%s2738_s2 + $0x18] sm:$0xff]  ;;  %v2466_v40 = vld [vmem:[%s2738_s2 + $0x20] sm:$0x1]  ;;  %vm245_vm8 = vcmask 123904   ;;  %s2342_s2 = smov 48  }
  0x19   :  { %v2453_v38 = vpack.c.bf16 %v42_v37, %v41_v35  ;;  %s2343_s24 = smov 80   ;;  %s2345_s25 = smov 112   ;;  %vm1641_vm9 = vcmask 523264   ;;  %vm1643_vm10 = vcmask 654336   ;;  %vm1645_vm11 = vcmask 785408  }
  0x1a   :  { %2068 = vmatpush3.bf16.msra.mxu1 %v2447_v36  ;;  %s2346_s26 = smov [#allocation5]   ;;  %vm1647_vm12 = vcmask 916480  }
  0x1b   :  { %2062 = vmatpush3.bf16.msra.mxu0 %v2403_v9  ;;  %2069 = vmatprep.subr.bf16.mxu1 %v2337_v0  ;;  %s1656_s27 = sshll.u32 %s2346_s26, 4  ;;  %s1657_s27 = int_to_ptr.vmem [resolvable:$true] %s1656_s27 }
  0x1c   :  { %2063 = vmatprep.subr.bf16.mxu0 %v2337_v0  ;;  %s2308_s0 = scalar_lea.vmem %s1657_s27, 32  ;;  %p2313_p9 = scmp.lt.s32.totalorder %s1657_s27, %s1657_s27 }
  0x1d   :  { %p2309_p8 = scmp.ne.s32.totalorder %s1657_s27, %s2308_s0  ;;  %p2314_p10 = scmp.lt.s32.totalorder %s2308_s0, %s2308_s0 }
  0x1e   :  { %2071 = vmatpush3.bf16.msra.mxu1 %v2453_v38 }
  0x1f   :  { %2065 = vmatpush3.bf16.msra.mxu0 %v2414_v12  ;;  %1842 = vmatprep.subr.mxu1 %v2339_v1  ;;  %p2315_p11 = por %p2314_p10, %p2313_p9 }
  0x20   :  { %1829 = vmatprep.subr.mxu0 %v2339_v1 }
  0x21   :  { %p2316_p12 = pnand %p2315_p11, %p2309_p8 }
  0x22   :  { %1843 = vmatpush3.msk.msra.mxu1 %vm60_vm1, %v2466_v40 }
  0x23   :  { %1830 = vmatpush3.msk.msra.mxu0 %vm60_vm1, %v2422_v13  ;;  %2072 = vmatprep.subr.bf16.mxu1 %v2337_v0 }
  0x24   :  { %2081 = vmatprep.subr.bf16.mxu0 %v2337_v0 }
  0x88   :  { %v50_v17 = vpop.permute.xlu0 %49  ;;  %v143_v29 = vpop.permute.xlu1 %142 }
  0x89   :  { %v53_v18 = vsel %vm52_vm3, %v47_v16, %v50_v17 }
  0x8a   :  { %v55_v19 = vsel %vm54_vm4, %v53_v18, 1.0 }
  0x8b   :  { %1832 = vmatmul.mubr.msk.f32.vlgmr.msra.gmra.mrb[0].mxu0 %vm56_vm5, %v55_v19 }
  0x8c   :  { %1874 = vmatprep.mubr.msk.f32.mxu0 %vm2338_vm0, %v2339_v1  ;;  %2083 = vmatpush3.bf16.msra.mxu0 %v2447_v36 }
  0x8d   :  { %2084 = vmatprep.subr.bf16.mxu0 %v2337_v0 }
  0x90   :  { %2086 = vmatpush3.bf16.msra.mxu0 %v2453_v38 }
  0x91   :  { %1872 = vmatprep.subr.mxu0 %v2339_v1 }
  0x94   :  { %1873 = vmatpush3.msk.msra.mxu0 %vm60_vm1, %v2466_v40 }
  0x95   :  { %2087 = vmatprep.subr.bf16.mxu0 %v2337_v0 }
 0x15e   :  { %v130_v20 = vpop.f32.mrb[0].mxu0 }
 0x15f   :  { %2190 = vtanh.f32 %v130_v20  ;;  %v1833_v21 = vpop.f32.mrb[1].mxu0  ;;  %v1667_v23 = vmul.f32 -1.442695, %v130_v20 }
 0x161   :  { %2192 = vpow2.f32 %v1667_v23 }
 0x169   :  { %v2191_v22 = vpop.eup %2190 }
 0x16a   :  { %147 = vrot.lane.b32.xlu0 %v2191_v22, %s2341_s1 }
 0x16b   :  { %v2193_v24 = vpop.eup %2192 }
 0x16c   :  { %v137_v25 = vadd.f32 1.0, %v2193_v24 }
 0x16e   :  { %2194 = vrcp.f32 %v137_v25 }
 0x178   :  { %v2195_v26 = vpop.eup %2194 }
 0x179   :  { %v145_v30 = vmul.f32 %v2195_v26, %v143_v29 }
 0x1dc   :  { %v148_v27 = vpop.permute.xlu0 %147 }
 0x1dd   :  { %v150_v28 = vmul.f32 %v2195_v26, %v148_v27 }
 0x1df   :  { %152 = vrot.lane.b32.xlu1 %v150_v28, %s2335_s22 }
 0x251   :  { %v153_v31 = vpop.permute.xlu1 %152 }
 0x252   :  { %v2435_v32 = vadd.f32 %v153_v31, %v145_v30 }
 0x254   :  { %2196 = vtanh.f32 %v2435_v32 }
 0x25e   :  { %v2197_v39 = vpop.eup %2196 }
 0x25f   :  { %158 = vrot.lane.b32.xlu0 %v2197_v39, %s2341_s1 }
 0x2d1   :  { %v159_v41 = vpop.permute.xlu0 %158 }
 0x2d2   :  { %v161_v42 = vmul.f32 %v2195_v26, %v159_v41 }
 0x2d4   :  { %163 = vrot.lane.b32.xlu1 %v161_v42, %s2335_s22 }
 0x346   :  { %v164_v43 = vpop.permute.xlu1 %163 }
 0x347   :  { %v167_v44 = vsel %vm166_vm6, %v164_v43, 1.0 }
 0x348   :  { %1845 = vmatmul.mubr.msk.f32.vlgmr.msra.gmra.mrb[0].mxu1 %vm168_vm7, %v167_v44 }
 0x349   :  { %2074 = vmatpush3.bf16.msra.mxu1 %v2394_v5  ;;  %1861 = vmatprep.mubr.msk.f32.mxu1 %vm2338_vm0, %v2339_v1 }
 0x34a   :  { %2075 = vmatprep.subr.bf16.mxu1 %v2337_v0 }
 0x34d   :  { %2077 = vmatpush3.bf16.msra.mxu1 %v2403_v9 }
 0x34e   :  { %2078 = vmatprep.subr.bf16.mxu1 %v2337_v0 }
 0x351   :  { %2080 = vmatpush3.bf16.msra.mxu1 %v2414_v12 }
 0x352   :  { %1859 = vmatprep.subr.mxu1 %v2339_v1 }
 0x355   :  { %1860 = vmatpush3.msk.msra.mxu1 %vm60_vm1, %v2422_v13 }
 0x356   :  { %2096 = vmatprep.subr.bf16.mxu1 %v2337_v0 }
 0x41b   :  { %v241_v45 = vpop.f32.mrb[0].mxu1 }
 0x41c   :  { %v1846_v46 = vpop.f32.mrb[1].mxu1  ;;  %v246_v47 = vsel %vm245_vm8, %v241_v45, -inf }
 0x41d   :  { %247 = vmax.xlane.f32.xlu0 %v246_v47 }
 0x433   :  { %259 = vrot.lane.b32.xlu0 %v161_v42, %s2342_s2 }
 0x4aa   :  { %v248_v48 = vpop.xlane.xlu0 %247 }
 0x4ab   :  { %v249_v49 = vsub.f32 %v241_v45, %v248_v48 }
 0x4ad   :  { %v250_v50 = vmul.f32 1.442695, %v249_v49 }
 0x4ae   :  { %v260_v58 = vpop.permute.xlu0 %259 }
 0x4af   :  { %2198 = vpow2.f32 %v250_v50 }
 0x4b9   :  { %v2199_v51 = vpop.eup %2198 }
 0x4ba   :  { %v252_v52 = vsel %vm245_vm8, %v2199_v51, 0.0 }
 0x4bb   :  { %253 = vadd.xlane.f32.xlu1 %v252_v52 }
 0x548   :  { %v254_v53 = vpop.xlane.xlu1 %253 }
 0x549   :  { %2200 = vlog2.f32 %v254_v53 }
 0x553   :  { %v2201_v54 = vpop.eup %2200 }
 0x554   :  { %v256_v55 = vmul.f32 0.6931472, %v2201_v54 }
 0x556   :  { %v257_v56 = vadd.f32 %v256_v55, %v248_v48 }
 0x558   :  { %v2491_v57 = vsub.f32 %v241_v45, %v257_v56 }
 0x55a   :  { %v262_v59 = vsel %vm52_vm3, %v2491_v57, %v260_v58 }
 0x55b   :  { %v263_v60 = vsel %vm54_vm4, %v262_v59, 1.0 }
 0x55c   :  { %1862 = vmatmul.mubr.msk.f32.vlgmr.msra.gmra.mrb[2].mxu1 %vm56_vm5, %v263_v60 }
 0x55d   :  { %2098 = vmatpush3.bf16.msra.mxu1 %v2447_v36  ;;  %1904 = vmatprep.mubr.msk.f32.mxu1 %vm2338_vm0, %v2339_v1 }
 0x55e   :  { %2099 = vmatprep.subr.bf16.mxu1 %v2337_v0 }
 0x561   :  { %2101 = vmatpush3.bf16.msra.mxu1 %v2453_v38 }
 0x562   :  { %1902 = vmatprep.subr.mxu1 %v2339_v1 }
 0x565   :  { %1903 = vmatpush3.msk.msra.mxu1 %vm60_vm1, %v2466_v40 }
 0x566   :  { %2102 = vmatprep.subr.bf16.mxu1 %v2337_v0 }
 0x62f   :  { %v333_v61 = vpop.f32.mrb[2].mxu1 }
 0x630   :  { %2202 = vtanh.f32 %v333_v61  ;;  %v1863_v62 = vpop.f32.mrb[3].mxu1  ;;  %v1672_v2 = vmul.f32 -1.442695, %v333_v61 }
 0x632   :  { %2204 = vpow2.f32 %v1672_v2 }
 0x63a   :  { %v2203_v63 = vpop.eup %2202 }
 0x63b   :  { %346 = vrot.lane.b32.xlu1 %v2203_v63, %s2341_s1 }
 0x63c   :  { %v2205_v3 = vpop.eup %2204 }
 0x63d   :  { %v340_v4 = vadd.f32 1.0, %v2205_v3 }
 0x63f   :  { %2206 = vrcp.f32 %v340_v4 }
 0x649   :  { %v2207_v6 = vpop.eup %2206 }
 0x64a   :  { %v344_v10 = vmul.f32 %v2207_v6, %v2435_v32 }
 0x6ad   :  { %v347_v7 = vpop.permute.xlu1 %346 }
 0x6ae   :  { %v349_v8 = vmul.f32 %v2207_v6, %v347_v7 }
 0x6b0   :  { %351 = vrot.lane.b32.xlu0 %v349_v8, %s2335_s22 }
 0x722   :  { %v352_v11 = vpop.permute.xlu0 %351 }
 0x723   :  { %v354_v14 = vadd.f32 %v352_v11, %v344_v10 }
 0x725   :  { %2208 = vtanh.f32 %v354_v14 }
 0x72f   :  { %v2209_v15 = vpop.eup %2208 }
 0x730   :  { %357 = vrot.lane.b32.xlu1 %v2209_v15, %s2341_s1 }
 0x7a2   :  { %v358_v16 = vpop.permute.xlu1 %357 }
 0x7a3   :  { %v360_v17 = vmul.f32 %v2207_v6, %v358_v16 }
 0x7a5   :  { %362 = vrot.lane.b32.xlu0 %v360_v17, %s2335_s22 }
 0x817   :  { %v363_v18 = vpop.permute.xlu0 %362 }
 0x818   :  { %v365_v19 = vsel %vm166_vm6, %v363_v18, 1.0 }
 0x819   :  { %1875 = vmatmul.mubr.msk.f32.vlgmr.msra.gmra.mrb[2].mxu0 %vm168_vm7, %v365_v19 }
 0x81a   :  { %2089 = vmatpush3.bf16.msra.mxu0 %v2394_v5  ;;  %1891 = vmatprep.mubr.msk.f32.mxu0 %vm2338_vm0, %v2339_v1 }
 0x81b   :  { %2090 = vmatprep.subr.bf16.mxu0 %v2337_v0 }
 0x81e   :  { %2092 = vmatpush3.bf16.msra.mxu0 %v2403_v9 }
 0x81f   :  { %2093 = vmatprep.subr.bf16.mxu0 %v2337_v0 }
 0x822   :  { %2095 = vmatpush3.bf16.msra.mxu0 %v2414_v12 }
 0x823   :  { %1889 = vmatprep.subr.mxu0 %v2339_v1 }
 0x826   :  { %1890 = vmatpush3.msk.msra.mxu0 %vm60_vm1, %v2422_v13 }
 0x827   :  { %2111 = vmatprep.subr.bf16.mxu0 %v2337_v0 }
 0x8ec   :  { %v435_v20 = vpop.f32.mrb[2].mxu0 }
 0x8ed   :  { %v1876_v21 = vpop.f32.mrb[3].mxu0  ;;  %v439_v22 = vsel %vm245_vm8, %v435_v20, -inf }
 0x8ee   :  { %440 = vmax.xlane.f32.xlu1 %v439_v22 }
 0x97b   :  { %v441_v23 = vpop.xlane.xlu1 %440 }
 0x97c   :  { %v442_v24 = vsub.f32 %v435_v20, %v441_v23 }
 0x97e   :  { %v443_v25 = vmul.f32 1.442695, %v442_v24 }
 0x980   :  { %2210 = vpow2.f32 %v443_v25 }
 0x98a   :  { %v2211_v26 = vpop.eup %2210 }
 0x98b   :  { %v445_v27 = vsel %vm245_vm8, %v2211_v26, 0.0 }
 0x98c   :  { %446 = vadd.xlane.f32.xlu0 %v445_v27 }
 0x9a2   :  { %452 = vrot.lane.b32.xlu0 %v360_v17, %s2342_s2 }
 0xa19   :  { %v447_v28 = vpop.xlane.xlu0 %446 }
 0xa1a   :  { %2212 = vlog2.f32 %v447_v28 }
 0xa1d   :  { %v453_v33 = vpop.permute.xlu0 %452 }
 0xa24   :  { %v2213_v29 = vpop.eup %2212 }
 0xa25   :  { %v449_v30 = vmul.f32 0.6931472, %v2213_v29 }
 0xa27   :  { %v450_v31 = vadd.f32 %v449_v30, %v441_v23 }
 0xa29   :  { %v2527_v32 = vsub.f32 %v435_v20, %v450_v31 }
 0xa2b   :  { %v455_v34 = vsel %vm52_vm3, %v2527_v32, %v453_v33 }
 0xa2c   :  { %v456_v35 = vsel %vm54_vm4, %v455_v34, 1.0 }
 0xa2d   :  { %1892 = vmatmul.mubr.msk.f32.vlgmr.msra.gmra.mrb[4].mxu0 %vm56_vm5, %v456_v35 }
 0xa2e   :  { %2113 = vmatpush3.bf16.msra.mxu0 %v2447_v36  ;;  %1934 = vmatprep.mubr.msk.f32.mxu0 %vm2338_vm0, %v2339_v1 }
 0xa2f   :  { %2114 = vmatprep.subr.bf16.mxu0 %v2337_v0 }
 0xa32   :  { %2116 = vmatpush3.bf16.msra.mxu0 %v2453_v38 }
 0xa33   :  { %1932 = vmatprep.subr.mxu0 %v2339_v1 }
 0xa36   :  { %1933 = vmatpush3.msk.msra.mxu0 %vm60_vm1, %v2466_v40 }
 0xa37   :  { %2117 = vmatprep.subr.bf16.mxu0 %v2337_v0 }
 0xb00   :  { %v526_v37 = vpop.f32.mrb[4].mxu0 }
 0xb01   :  { %2214 = vtanh.f32 %v526_v37  ;;  %v1893_v39 = vpop.f32.mrb[5].mxu0  ;;  %v1677_v42 = vmul.f32 -1.442695, %v526_v37 }
 0xb03   :  { %2216 = vpow2.f32 %v1677_v42 }
 0xb0b   :  { %v2215_v41 = vpop.eup %2214 }
 0xb0c   :  { %539 = vrot.lane.b32.xlu1 %v2215_v41, %s2341_s1 }
 0xb0d   :  { %v2217_v43 = vpop.eup %2216 }
 0xb0e   :  { %v533_v44 = vadd.f32 1.0, %v2217_v43 }
 0xb10   :  { %2218 = vrcp.f32 %v533_v44 }
 0xb1a   :  { %v2219_v45 = vpop.eup %2218 }
 0xb1b   :  { %v537_v48 = vmul.f32 %v2219_v45, %v354_v14 }
 0xb7e   :  { %v540_v46 = vpop.permute.xlu1 %539 }
 0xb7f   :  { %v542_v47 = vmul.f32 %v2219_v45, %v540_v46 }
 0xb81   :  { %544 = vrot.lane.b32.xlu1 %v542_v47, %s2335_s22 }
 0xbf3   :  { %v545_v49 = vpop.permute.xlu1 %544 }
 0xbf4   :  { %v547_v50 = vadd.f32 %v545_v49, %v537_v48 }
 0xbf6   :  { %2220 = vtanh.f32 %v547_v50 }
 0xc00   :  { %v2221_v51 = vpop.eup %2220 }
 0xc01   :  { %550 = vrot.lane.b32.xlu0 %v2221_v51, %s2341_s1 }
 0xc73   :  { %v551_v52 = vpop.permute.xlu0 %550 }
 0xc74   :  { %v553_v53 = vmul.f32 %v2219_v45, %v551_v52 }
 0xc76   :  { %555 = vrot.lane.b32.xlu1 %v553_v53, %s2335_s22 }
 0xce8   :  { %v556_v54 = vpop.permute.xlu1 %555 }
 0xce9   :  { %v558_v55 = vsel %vm166_vm6, %v556_v54, 1.0 }
 0xcea   :  { %1905 = vmatmul.mubr.msk.f32.vlgmr.msra.gmra.mrb[4].mxu1 %vm168_vm7, %v558_v55 }
 0xceb   :  { %2104 = vmatpush3.bf16.msra.mxu1 %v2394_v5  ;;  %1921 = vmatprep.mubr.msk.f32.mxu1 %vm2338_vm0, %v2339_v1 }
 0xcec   :  { %2105 = vmatprep.subr.bf16.mxu1 %v2337_v0 }
 0xcef   :  { %2107 = vmatpush3.bf16.msra.mxu1 %v2403_v9 }
 0xcf0   :  { %2108 = vmatprep.subr.bf16.mxu1 %v2337_v0 }
 0xcf3   :  { %2110 = vmatpush3.bf16.msra.mxu1 %v2414_v12 }
 0xcf4   :  { %1919 = vmatprep.subr.mxu1 %v2339_v1 }
 0xcf7   :  { %1920 = vmatpush3.msk.msra.mxu1 %vm60_vm1, %v2422_v13 }
 0xcf8   :  { %2126 = vmatprep.subr.bf16.mxu1 %v2337_v0 }
 0xdbd   :  { %v628_v56 = vpop.f32.mrb[4].mxu1 }
 0xdbe   :  { %v1906_v58 = vpop.f32.mrb[5].mxu1  ;;  %v632_v59 = vsel %vm245_vm8, %v628_v56, -inf }
 0xdbf   :  { %633 = vmax.xlane.f32.xlu0 %v632_v59 }
 0xdd5   :  { %645 = vrot.lane.b32.xlu0 %v553_v53, %s2342_s2 }
 0xe4c   :  { %v634_v60 = vpop.xlane.xlu0 %633 }
 0xe4d   :  { %v635_v61 = vsub.f32 %v628_v56, %v634_v60 }
 0xe4f   :  { %v636_v62 = vmul.f32 1.442695, %v635_v61 }
 0xe50   :  { %v646_v10 = vpop.permute.xlu0 %645 }
 0xe51   :  { %2222 = vpow2.f32 %v636_v62 }
 0xe5b   :  { %v2223_v63 = vpop.eup %2222 }
 0xe5c   :  { %v638_v2 = vsel %vm245_vm8, %v2223_v63, 0.0 }
 0xe5d   :  { %639 = vadd.xlane.f32.xlu1 %v638_v2 }
 0xeea   :  { %v640_v3 = vpop.xlane.xlu1 %639 }
 0xeeb   :  { %2224 = vlog2.f32 %v640_v3 }
 0xef5   :  { %v2225_v4 = vpop.eup %2224 }
 0xef6   :  { %v642_v6 = vmul.f32 0.6931472, %v2225_v4 }
 0xef8   :  { %v643_v7 = vadd.f32 %v642_v6, %v634_v60 }
 0xefa   :  { %v2562_v8 = vsub.f32 %v628_v56, %v643_v7 }
 0xefc   :  { %v648_v11 = vsel %vm52_vm3, %v2562_v8, %v646_v10 }
 0xefd   :  { %v649_v14 = vsel %vm54_vm4, %v648_v11, 1.0 }
 0xefe   :  { %1922 = vmatmul.mubr.msk.f32.vlgmr.msra.gmra.mrb[6].mxu1 %vm56_vm5, %v649_v14 }
 0xeff   :  { %2128 = vmatpush3.bf16.msra.mxu1 %v2447_v36  ;;  %1964 = vmatprep.mubr.msk.f32.mxu1 %vm2338_vm0, %v2339_v1 }
 0xf00   :  { %2129 = vmatprep.subr.bf16.mxu1 %v2337_v0 }
 0xf03   :  { %2131 = vmatpush3.bf16.msra.mxu1 %v2453_v38 }
 0xf04   :  { %1962 = vmatprep.subr.mxu1 %v2339_v1 }
 0xf07   :  { %1963 = vmatpush3.msk.msra.mxu1 %vm60_vm1, %v2466_v40 }
 0xf08   :  { %2132 = vmatprep.subr.bf16.mxu1 %v2337_v0 }
 0xfd1   :  { %v719_v15 = vpop.f32.mrb[6].mxu1 }
 0xfd2   :  { %2226 = vtanh.f32 %v719_v15  ;;  %v1923_v16 = vpop.f32.mrb[7].mxu1  ;;  %v1682_v18 = vmul.f32 -1.442695, %v719_v15 }
 0xfd4   :  { %2228 = vpow2.f32 %v1682_v18 }
 0xfdc   :  { %v2227_v17 = vpop.eup %2226 }
 0xfdd   :  { %732 = vrot.lane.b32.xlu1 %v2227_v17, %s2341_s1 }
 0xfde   :  { %v2229_v19 = vpop.eup %2228 }
 0xfdf   :  { %v726_v20 = vadd.f32 1.0, %v2229_v19 }
 0xfe1   :  { %2230 = vrcp.f32 %v726_v20 }
 0xfeb   :  { %v2231_v21 = vpop.eup %2230 }
 0xfec   :  { %v730_v24 = vmul.f32 %v2231_v21, %v547_v50 }
0x104f   :  { %v733_v22 = vpop.permute.xlu1 %732 }
0x1050   :  { %v735_v23 = vmul.f32 %v2231_v21, %v733_v22 }
0x1052   :  { %737 = vrot.lane.b32.xlu0 %v735_v23, %s2335_s22 }
0x10c4   :  { %v738_v25 = vpop.permute.xlu0 %737 }
0x10c5   :  { %v740_v26 = vadd.f32 %v738_v25, %v730_v24 }
0x10c7   :  { %2232 = vtanh.f32 %v740_v26 }
0x10d1   :  { %v2233_v27 = vpop.eup %2232 }
0x10d2   :  { %743 = vrot.lane.b32.xlu1 %v2233_v27, %s2341_s1 }
0x1144   :  { %v744_v28 = vpop.permute.xlu1 %743 }
0x1145   :  { %v746_v29 = vmul.f32 %v2231_v21, %v744_v28 }
0x1147   :  { %748 = vrot.lane.b32.xlu0 %v746_v29, %s2335_s22 }
0x11b9   :  { %v749_v30 = vpop.permute.xlu0 %748 }
0x11ba   :  { %v751_v31 = vsel %vm166_vm6, %v749_v30, 1.0 }
0x11bb   :  { %1935 = vmatmul.mubr.msk.f32.vlgmr.msra.gmra.mrb[6].mxu0 %vm168_vm7, %v751_v31 }
0x11bc   :  { %2119 = vmatpush3.bf16.msra.mxu0 %v2394_v5  ;;  %1951 = vmatprep.mubr.msk.f32.mxu0 %vm2338_vm0, %v2339_v1 }
0x11bd   :  { %2120 = vmatprep.subr.bf16.mxu0 %v2337_v0 }
0x11c0   :  { %2122 = vmatpush3.bf16.msra.mxu0 %v2403_v9 }
0x11c1   :  { %2123 = vmatprep.subr.bf16.mxu0 %v2337_v0 }
0x11c4   :  { %2125 = vmatpush3.bf16.msra.mxu0 %v2414_v12 }
0x11c5   :  { %1949 = vmatprep.subr.mxu0 %v2339_v1 }
0x11c8   :  { %1950 = vmatpush3.msk.msra.mxu0 %vm60_vm1, %v2422_v13 }
0x11c9   :  { %2141 = vmatprep.subr.bf16.mxu0 %v2337_v0 }
0x128e   :  { %v821_v33 = vpop.f32.mrb[6].mxu0 }
0x128f   :  { %v1936_v34 = vpop.f32.mrb[7].mxu0  ;;  %v825_v35 = vsel %vm245_vm8, %v821_v33, -inf }
0x1290   :  { %826 = vmax.xlane.f32.xlu1 %v825_v35 }
0x131d   :  { %v827_v37 = vpop.xlane.xlu1 %826 }
0x131e   :  { %v828_v39 = vsub.f32 %v821_v33, %v827_v37 }
0x1320   :  { %v829_v41 = vmul.f32 1.442695, %v828_v39 }
0x1322   :  { %2234 = vpow2.f32 %v829_v41 }
0x132c   :  { %v2235_v42 = vpop.eup %2234 }
0x132d   :  { %v831_v43 = vsel %vm245_vm8, %v2235_v42, 0.0 }
0x132e   :  { %832 = vadd.xlane.f32.xlu0 %v831_v43 }
0x1344   :  { %838 = vrot.lane.b32.xlu0 %v746_v29, %s2342_s2 }
0x13bb   :  { %v833_v44 = vpop.xlane.xlu0 %832 }
0x13bc   :  { %2236 = vlog2.f32 %v833_v44 }
0x13bf   :  { %v839_v49 = vpop.permute.xlu0 %838 }
0x13c6   :  { %v2237_v45 = vpop.eup %2236 }
0x13c7   :  { %v835_v46 = vmul.f32 0.6931472, %v2237_v45 }
0x13c9   :  { %v836_v47 = vadd.f32 %v835_v46, %v827_v37 }
0x13cb   :  { %v2597_v48 = vsub.f32 %v821_v33, %v836_v47 }
0x13cd   :  { %v841_v50 = vsel %vm52_vm3, %v2597_v48, %v839_v49 }
0x13ce   :  { %v842_v51 = vsel %vm54_vm4, %v841_v50, 1.0 }
0x13cf   :  { %1952 = vmatmul.mubr.msk.f32.vlgmr.msra.gmra.mrb[8].mxu0 %vm56_vm5, %v842_v51 }
0x13d0   :  { %2143 = vmatpush3.bf16.msra.mxu0 %v2447_v36  ;;  %1994 = vmatprep.mubr.msk.f32.mxu0 %vm2338_vm0, %v2339_v1 }
0x13d1   :  { %2144 = vmatprep.subr.bf16.mxu0 %v2337_v0 }
0x13d4   :  { %2146 = vmatpush3.bf16.msra.mxu0 %v2453_v38 }
0x13d5   :  { %1992 = vmatprep.subr.mxu0 %v2339_v1 }
0x13d8   :  { %1993 = vmatpush3.msk.msra.mxu0 %vm60_vm1, %v2466_v40 }
0x13d9   :  { %2147 = vmatprep.subr.bf16.mxu0 %v2337_v0 }
0x14a2   :  { %v912_v52 = vpop.f32.mrb[8].mxu0 }
0x14a3   :  { %2238 = vtanh.f32 %v912_v52  ;;  %v1953_v53 = vpop.f32.mrb[9].mxu0  ;;  %v1687_v55 = vmul.f32 -1.442695, %v912_v52 }
0x14a5   :  { %2240 = vpow2.f32 %v1687_v55 }
0x14ad   :  { %v2239_v54 = vpop.eup %2238 }
0x14ae   :  { %925 = vrot.lane.b32.xlu1 %v2239_v54, %s2341_s1 }
0x14af   :  { %v2241_v56 = vpop.eup %2240 }
0x14b0   :  { %v919_v58 = vadd.f32 1.0, %v2241_v56 }
0x14b2   :  { %2242 = vrcp.f32 %v919_v58 }
0x14bc   :  { %v2243_v59 = vpop.eup %2242 }
0x14bd   :  { %v923_v62 = vmul.f32 %v2243_v59, %v740_v26 }
0x1520   :  { %v926_v60 = vpop.permute.xlu1 %925 }
0x1521   :  { %v928_v61 = vmul.f32 %v2243_v59, %v926_v60 }
0x1523   :  { %930 = vrot.lane.b32.xlu1 %v928_v61, %s2335_s22 }
0x1595   :  { %v931_v63 = vpop.permute.xlu1 %930 }
0x1596   :  { %v933_v2 = vadd.f32 %v931_v63, %v923_v62 }
0x1598   :  { %2244 = vtanh.f32 %v933_v2 }
0x15a2   :  { %v2245_v3 = vpop.eup %2244 }
0x15a3   :  { %936 = vrot.lane.b32.xlu0 %v2245_v3, %s2341_s1 }
0x1615   :  { %v937_v4 = vpop.permute.xlu0 %936 }
0x1616   :  { %v939_v6 = vmul.f32 %v2243_v59, %v937_v4 }
0x1618   :  { %941 = vrot.lane.b32.xlu1 %v939_v6, %s2335_s22 }
0x168a   :  { %v942_v7 = vpop.permute.xlu1 %941 }
0x168b   :  { %v944_v10 = vsel %vm166_vm6, %v942_v7, 1.0 }
0x168c   :  { %1965 = vmatmul.mubr.msk.f32.vlgmr.msra.gmra.mrb[8].mxu1 %vm168_vm7, %v944_v10 }
0x168d   :  { %2134 = vmatpush3.bf16.msra.mxu1 %v2394_v5  ;;  %1981 = vmatprep.mubr.msk.f32.mxu1 %vm2338_vm0, %v2339_v1 }
0x168e   :  { %2135 = vmatprep.subr.bf16.mxu1 %v2337_v0 }
0x1691   :  { %2137 = vmatpush3.bf16.msra.mxu1 %v2403_v9 }
0x1692   :  { %2138 = vmatprep.subr.bf16.mxu1 %v2337_v0 }
0x1695   :  { %2140 = vmatpush3.bf16.msra.mxu1 %v2414_v12 }
0x1696   :  { %1979 = vmatprep.subr.mxu1 %v2339_v1 }
0x1699   :  { %1980 = vmatpush3.msk.msra.mxu1 %vm60_vm1, %v2422_v13 }
0x169a   :  { %2156 = vmatprep.subr.bf16.mxu1 %v2337_v0 }
0x175f   :  { %v1014_v11 = vpop.f32.mrb[8].mxu1 }
0x1760   :  { %v1966_v14 = vpop.f32.mrb[9].mxu1  ;;  %v1018_v15 = vsel %vm245_vm8, %v1014_v11, -inf }
0x1761   :  { %1019 = vmax.xlane.f32.xlu0 %v1018_v15 }
0x1777   :  { %1031 = vrot.lane.b32.xlu0 %v939_v6, %s2342_s2 }
0x17ee   :  { %v1020_v16 = vpop.xlane.xlu0 %1019 }
0x17ef   :  { %v1021_v17 = vsub.f32 %v1014_v11, %v1020_v16 }
0x17f1   :  { %v1022_v18 = vmul.f32 1.442695, %v1021_v17 }
0x17f2   :  { %v1032_v26 = vpop.permute.xlu0 %1031 }
0x17f3   :  { %2246 = vpow2.f32 %v1022_v18 }
0x17fd   :  { %v2247_v19 = vpop.eup %2246 }
0x17fe   :  { %v1024_v20 = vsel %vm245_vm8, %v2247_v19, 0.0 }
0x17ff   :  { %1025 = vadd.xlane.f32.xlu1 %v1024_v20 }
0x188c   :  { %v1026_v21 = vpop.xlane.xlu1 %1025 }
0x188d   :  { %2248 = vlog2.f32 %v1026_v21 }
0x1897   :  { %v2249_v22 = vpop.eup %2248 }
0x1898   :  { %v1028_v23 = vmul.f32 0.6931472, %v2249_v22 }
0x189a   :  { %v1029_v24 = vadd.f32 %v1028_v23, %v1020_v16 }
0x189c   :  { %v2632_v25 = vsub.f32 %v1014_v11, %v1029_v24 }
0x189e   :  { %v1034_v27 = vsel %vm52_vm3, %v2632_v25, %v1032_v26 }
0x189f   :  { %v1035_v28 = vsel %vm54_vm4, %v1034_v27, 1.0 }
0x18a0   :  { %1982 = vmatmul.mubr.msk.f32.vlgmr.msra.gmra.mrb[10].mxu1 %vm56_vm5, %v1035_v28 }
0x18a1   :  { %2158 = vmatpush3.bf16.msra.mxu1 %v2447_v36  ;;  %2024 = vmatprep.mubr.msk.f32.mxu1 %vm2338_vm0, %v2339_v1 }
0x18a2   :  { %2159 = vmatprep.subr.bf16.mxu1 %v2337_v0 }
0x18a5   :  { %2161 = vmatpush3.bf16.msra.mxu1 %v2453_v38 }
0x18a6   :  { %2022 = vmatprep.subr.mxu1 %v2339_v1 }
0x18a9   :  { %2023 = vmatpush3.msk.msra.mxu1 %vm60_vm1, %v2466_v40 }
0x18aa   :  { %2162 = vmatprep.subr.bf16.mxu1 %v2337_v0 }
0x1973   :  { %v1105_v29 = vpop.f32.mrb[10].mxu1 }
0x1974   :  { %2250 = vtanh.f32 %v1105_v29  ;;  %v1983_v30 = vpop.f32.mrb[11].mxu1  ;;  %v1692_v33 = vmul.f32 -1.442695, %v1105_v29 }
0x1976   :  { %2252 = vpow2.f32 %v1692_v33 }
0x197e   :  { %v2251_v31 = vpop.eup %2250 }
0x197f   :  { %1118 = vrot.lane.b32.xlu1 %v2251_v31, %s2341_s1 }
0x1980   :  { %v2253_v34 = vpop.eup %2252 }
0x1981   :  { %v1112_v35 = vadd.f32 1.0, %v2253_v34 }
0x1983   :  { %2254 = vrcp.f32 %v1112_v35 }
0x198d   :  { %v2255_v37 = vpop.eup %2254 }
0x198e   :  { %v1116_v42 = vmul.f32 %v2255_v37, %v933_v2 }
0x19f1   :  { %v1119_v39 = vpop.permute.xlu1 %1118 }
0x19f2   :  { %v1121_v41 = vmul.f32 %v2255_v37, %v1119_v39 }
0x19f4   :  { %1123 = vrot.lane.b32.xlu0 %v1121_v41, %s2335_s22 }
0x1a66   :  { %v1124_v43 = vpop.permute.xlu0 %1123 }
0x1a67   :  { %v1126_v44 = vadd.f32 %v1124_v43, %v1116_v42 }
0x1a69   :  { %2256 = vtanh.f32 %v1126_v44 }
0x1a73   :  { %v2257_v45 = vpop.eup %2256 }
0x1a74   :  { %1129 = vrot.lane.b32.xlu1 %v2257_v45, %s2341_s1 }
0x1ae6   :  { %v1130_v46 = vpop.permute.xlu1 %1129 }
0x1ae7   :  { %v1132_v47 = vmul.f32 %v2255_v37, %v1130_v46 }
0x1ae9   :  { %1134 = vrot.lane.b32.xlu0 %v1132_v47, %s2335_s22 }
0x1b5b   :  { %v1135_v49 = vpop.permute.xlu0 %1134 }
0x1b5c   :  { %v1137_v50 = vsel %vm166_vm6, %v1135_v49, 1.0 }
0x1b5d   :  { %1995 = vmatmul.mubr.msk.f32.vlgmr.msra.gmra.mrb[10].mxu0 %vm168_vm7, %v1137_v50 }
0x1b5e   :  { %2149 = vmatpush3.bf16.msra.mxu0 %v2394_v5  ;;  %2011 = vmatprep.mubr.msk.f32.mxu0 %vm2338_vm0, %v2339_v1 }
0x1b5f   :  { %2150 = vmatprep.subr.bf16.mxu0 %v2337_v0 }
0x1b62   :  { %2152 = vmatpush3.bf16.msra.mxu0 %v2403_v9 }
0x1b63   :  { %2153 = vmatprep.subr.bf16.mxu0 %v2337_v0 }
0x1b66   :  { %2155 = vmatpush3.bf16.msra.mxu0 %v2414_v12 }
0x1b67   :  { %2009 = vmatprep.subr.mxu0 %v2339_v1 }
0x1b6a   :  { %2010 = vmatpush3.msk.msra.mxu0 %vm60_vm1, %v2422_v13 }
0x1b6b   :  { %2171 = vmatprep.subr.bf16.mxu0 %v2337_v0 }
0x1c30   :  { %v1207_v51 = vpop.f32.mrb[10].mxu0 }
0x1c31   :  { %v1996_v52 = vpop.f32.mrb[11].mxu0  ;;  %v1211_v53 = vsel %vm245_vm8, %v1207_v51, -inf }
0x1c32   :  { %1212 = vmax.xlane.f32.xlu1 %v1211_v53 }
0x1cbf   :  { %v1213_v54 = vpop.xlane.xlu1 %1212 }
0x1cc0   :  { %v1214_v55 = vsub.f32 %v1207_v51, %v1213_v54 }
0x1cc2   :  { %v1215_v56 = vmul.f32 1.442695, %v1214_v55 }
0x1cc4   :  { %2258 = vpow2.f32 %v1215_v56 }
0x1cce   :  { %v2259_v58 = vpop.eup %2258 }
0x1ccf   :  { %v1217_v59 = vsel %vm245_vm8, %v2259_v58, 0.0 }
0x1cd0   :  { %1218 = vadd.xlane.f32.xlu0 %v1217_v59 }
0x1ce6   :  { %1224 = vrot.lane.b32.xlu0 %v1132_v47, %s2342_s2 }
0x1d5d   :  { %v1219_v60 = vpop.xlane.xlu0 %1218 }
0x1d5e   :  { %2260 = vlog2.f32 %v1219_v60 }
0x1d61   :  { %v1225_v3 = vpop.permute.xlu0 %1224 }
0x1d68   :  { %v2261_v61 = vpop.eup %2260 }
0x1d69   :  { %v1221_v62 = vmul.f32 0.6931472, %v2261_v61 }
0x1d6b   :  { %v1222_v63 = vadd.f32 %v1221_v62, %v1213_v54 }
0x1d6d   :  { %v2667_v2 = vsub.f32 %v1207_v51, %v1222_v63 }
0x1d6f   :  { %v1227_v4 = vsel %vm52_vm3, %v2667_v2, %v1225_v3 }
0x1d70   :  { %v1228_v6 = vsel %vm54_vm4, %v1227_v4, 1.0 }
0x1d71   :  { %2012 = vmatmul.mubr.msk.f32.vlgmr.msra.gmra.mrb[12].mxu0 %vm56_vm5, %v1228_v6 }
0x1d72   :  { %2173 = vmatpush3.bf16.msra.mxu0 %v2447_v36  ;;  %2054 = vmatprep.mubr.msk.f32.mxu0 %vm2338_vm0, %v2339_v1 }
0x1d73   :  { %2174 = vmatprep.subr.bf16.mxu0 %v2337_v0 }
0x1d76   :  { %2176 = vmatpush3.bf16.msra.mxu0 %v2453_v38 }
0x1d77   :  { %2052 = vmatprep.subr.mxu0 %v2339_v1 }
0x1d7a   :  { %2053 = vmatpush3.msk.msra.mxu0 %vm60_vm1, %v2466_v40 }
0x1e44   :  { %v1298_v7 = vpop.f32.mrb[12].mxu0 }
0x1e45   :  { %2262 = vtanh.f32 %v1298_v7  ;;  %v2013_v10 = vpop.f32.mrb[13].mxu0  ;;  %v1697_v14 = vmul.f32 -1.442695, %v1298_v7 }
0x1e47   :  { %2264 = vpow2.f32 %v1697_v14 }
0x1e4f   :  { %v2263_v11 = vpop.eup %2262 }
0x1e50   :  { %1311 = vrot.lane.b32.xlu1 %v2263_v11, %s2341_s1 }
0x1e51   :  { %v2265_v36 = vpop.eup %2264 }
0x1e52   :  { %v1305_v15 = vadd.f32 1.0, %v2265_v36 }
0x1e54   :  { %2266 = vrcp.f32 %v1305_v15 }
0x1e5e   :  { %v2267_v16 = vpop.eup %2266 }
0x1e5f   :  { %v1309_v38 = vmul.f32 %v2267_v16, %v1126_v44 }
0x1ec2   :  { %v1312_v17 = vpop.permute.xlu1 %1311 }
0x1ec3   :  { %v1314_v18 = vmul.f32 %v2267_v16, %v1312_v17 }
0x1ec5   :  { %1316 = vrot.lane.b32.xlu1 %v1314_v18, %s2335_s22 }
0x1f37   :  { %v1317_v19 = vpop.permute.xlu1 %1316 }
0x1f38   :  { %v1319_v20 = vadd.f32 %v1317_v19, %v1309_v38 }
0x1f3a   :  { %2268 = vtanh.f32 %v1319_v20 }
0x1f44   :  { %v2269_v40 = vpop.eup %2268 }
0x1f45   :  { %1322 = vrot.lane.b32.xlu0 %v2269_v40, %s2341_s1 }
0x1fb7   :  { %v1323_v21 = vpop.permute.xlu0 %1322 }
0x1fb8   :  { %v1325_v22 = vmul.f32 %v2267_v16, %v1323_v21 }
0x1fba   :  { %1327 = vrot.lane.b32.xlu1 %v1325_v22, %s2335_s22 }
0x202c   :  { %v1328_v23 = vpop.permute.xlu1 %1327 }
0x202d   :  { %v1330_v24 = vsel %vm166_vm6, %v1328_v23, 1.0 }
0x202e   :  { %2025 = vmatmul.mubr.msk.f32.vlgmr.msra.gmra.mrb[12].mxu1 %vm168_vm7, %v1330_v24 }
0x202f   :  { %2164 = vmatpush3.bf16.msra.mxu1 %v2394_v5  ;;  %2041 = vmatprep.mubr.msk.f32.mxu1 %vm2338_vm0, %v2339_v1 }
0x2030   :  { %2165 = vmatprep.subr.bf16.mxu1 %v2337_v0 }
0x2033   :  { %2167 = vmatpush3.bf16.msra.mxu1 %v2403_v9 }
0x2034   :  { %2168 = vmatprep.subr.bf16.mxu1 %v2337_v0 }
0x2037   :  { %2170 = vmatpush3.bf16.msra.mxu1 %v2414_v12 }
0x2038   :  { %2039 = vmatprep.subr.mxu1 %v2339_v1 }
0x203b   :  { %2040 = vmatpush3.msk.msra.mxu1 %vm60_vm1, %v2422_v13 }
0x2101   :  { %v1400_v26 = vpop.f32.mrb[12].mxu1 }
0x2102   :  { %v2026_v27 = vpop.f32.mrb[13].mxu1  ;;  %v1404_v5 = vsel %vm245_vm8, %v1400_v26, -inf }
0x2103   :  { %1405 = vmax.xlane.f32.xlu0 %v1404_v5 }
0x2119   :  { %1417 = vrot.lane.b32.xlu0 %v1325_v22, %s2342_s2 }
0x2190   :  { %v1406_v28 = vpop.xlane.xlu0 %1405 }
0x2191   :  { %v1407_v29 = vsub.f32 %v1400_v26, %v1406_v28 }
0x2193   :  { %v1408_v30 = vmul.f32 1.442695, %v1407_v29 }
0x2194   :  { %v1418_v34 = vpop.permute.xlu0 %1417 }
0x2195   :  { %2270 = vpow2.f32 %v1408_v30 }
0x219f   :  { %v2271_v9 = vpop.eup %2270 }
0x21a0   :  { %v1410_v0 = vsel %vm245_vm8, %v2271_v9, 0.0 }
0x21a1   :  { %1411 = vadd.xlane.f32.xlu1 %v1410_v0 }
0x222e   :  { %v1412_v12 = vpop.xlane.xlu1 %1411 }
0x222f   :  { %2272 = vlog2.f32 %v1412_v12 }
0x2239   :  { %v2273_v1 = vpop.eup %2272 }
0x223a   :  { %v1414_v31 = vmul.f32 0.6931472, %v2273_v1 }
0x223c   :  { %v1415_v13 = vadd.f32 %v1414_v31, %v1406_v28 }
0x223e   :  { %v1416_v33 = vsub.f32 %v1400_v26, %v1415_v13 }
0x2240   :  { %v1420_v35 = vsel %vm52_vm3, %v1416_v33, %v1418_v34 }
0x2241   :  { %v1421_v37 = vsel %vm54_vm4, %v1420_v35, 1.0 }
0x2242   :  { %2042 = vmatmul.mubr.msk.f32.vlgmr.msra.gmra.mrb[14].mxu1 %vm56_vm5, %v1421_v37 }
0x2315   :  { %v1491_v39 = vpop.f32.mrb[14].mxu1 }
0x2316   :  { %2274 = vtanh.f32 %v1491_v39  ;;  %v2043_v41 = vpop.f32.mrb[15].mxu1  ;;  %v1702_v43 = vmul.f32 -1.442695, %v1491_v39 }
0x2318   :  { %2276 = vpow2.f32 %v1702_v43 }
0x2320   :  { %v2275_v42 = vpop.eup %2274 }
0x2321   :  { %1504 = vrot.lane.b32.xlu1 %v2275_v42, %s2341_s1 }
0x2322   :  { %v2277_v44 = vpop.eup %2276 }
0x2323   :  { %v1498_v45 = vadd.f32 1.0, %v2277_v44 }
0x2325   :  { %2278 = vrcp.f32 %v1498_v45 }
0x232f   :  { %v2279_v46 = vpop.eup %2278 }
0x2330   :  { %v1502_v50 = vmul.f32 %v2279_v46, %v1319_v20 }
0x2393   :  { %v1505_v47 = vpop.permute.xlu1 %1504 }
0x2394   :  { %v1507_v49 = vmul.f32 %v2279_v46, %v1505_v47 }
0x2396   :  { %1509 = vrot.lane.b32.xlu0 %v1507_v49, %s2335_s22 }
0x2408   :  { %v1510_v51 = vpop.permute.xlu0 %1509 }
0x2409   :  { %v1512_v52 = vadd.f32 %v1510_v51, %v1502_v50 }
0x240b   :  { %2280 = vtanh.f32 %v1512_v52 }
0x2415   :  { %v2281_v53 = vpop.eup %2280 }
0x2416   :  { %1515 = vrot.lane.b32.xlu1 %v2281_v53, %s2341_s1 }
0x2488   :  { %v1516_v54 = vpop.permute.xlu1 %1515 }
0x2489   :  { %v1518_v55 = vmul.f32 %v2279_v46, %v1516_v54 }
0x248b   :  { %1520 = vrot.lane.b32.xlu0 %v1518_v55, %s2335_s22 }
0x24fd   :  { %v1521_v56 = vpop.permute.xlu0 %1520 }
0x24fe   :  { %v1523_v58 = vsel %vm166_vm6, %v1521_v56, 1.0 }
0x24ff   :  { %2055 = vmatmul.mubr.msk.f32.vlgmr.msra.gmra.mrb[14].mxu0 %vm168_vm7, %v1523_v58 }
0x25d2   :  { %v1593_v59 = vpop.f32.mrb[14].mxu0 }
0x25d3   :  { %v2056_v60 = vpop.f32.mrb[15].mxu0  ;;  %v1597_v61 = vsel %vm245_vm8, %v1593_v59, -inf }
0x25d4   :  { %1598 = vmax.xlane.f32.xlu1 %v1597_v61 }
0x25e5   :  { %1615 = vrot.lane.b32.xlu1 %v2562_v8, %s2335_s22  ;;  %s2344_s22 = smov 96  }
0x25e9   :  { %1619 = vrot.lane.b32.xlu1 %v2597_v48, %s2342_s2 }
0x25ed   :  { %1627 = vrot.lane.b32.xlu1 %v2667_v2, %s2343_s24 }
0x2661   :  { %v1599_v62 = vpop.xlane.xlu1 %1598 }
0x2662   :  { %v1600_v63 = vsub.f32 %v1593_v59, %v1599_v62 }
0x2664   :  { %v1601_v3 = vmul.f32 1.442695, %v1600_v63 }
0x2665   :  { %v1616_v11 = vpop.permute.xlu1 %1615 }
0x2666   :  { %2282 = vpow2.f32 %v1601_v3 }
0x2669   :  { %v1620_v15 = vpop.permute.xlu1 %1619 }
0x266d   :  { %v1628_v17 = vpop.permute.xlu1 %1627 }
0x2670   :  { %v2283_v4 = vpop.eup %2282 }
0x2671   :  { %v1603_v6 = vsel %vm245_vm8, %v2283_v4, 0.0 }
0x2672   :  { %1604 = vadd.xlane.f32.xlu0 %v1603_v6 }
0x2688   :  { %1611 = vrot.lane.b32.xlu0 %v2527_v32, %s2340_s29 }
0x268c   :  { %1623 = vrot.lane.b32.xlu0 %v2632_v25, %s2341_s1 }
0x2690   :  { %1631 = vrot.lane.b32.xlu0 %v1416_v33, %s2344_s22 }
0x26ff   :  { %v1605_v8 = vpop.xlane.xlu0 %1604 }
0x2700   :  { %2284 = vlog2.f32 %v1605_v8 }
0x2703   :  { %v1612_v14 = vpop.permute.xlu0 %1611 }
0x2704   :  { %v1638_v36 = vsel %vm52_vm3, %v2491_v57, %v1612_v14 }
0x2705   :  { %v1639_v32 = vsel %vm166_vm6, %v1638_v36, %v1616_v11 }
0x2706   :  { %v1640_v25 = vsel %vm54_vm4, %v1639_v32, %v1620_v15 }
0x2707   :  { %v1624_v16 = vpop.permute.xlu0 %1623 }
0x2708   :  { %v1642_v18 = vsel %vm1641_vm9, %v1640_v25, %v1624_v16 }
0x2709   :  { %v1644_v19 = vsel %vm1643_vm10, %v1642_v18, %v1628_v17 }
0x270a   :  { %v2285_v48 = vpop.eup %2284 }
0x270b   :  { %v1607_v2 = vmul.f32 0.6931472, %v2285_v48  ;;  %v1632_v38 = vpop.permute.xlu0 %1631 }
0x270c   :  { %v1646_v20 = vsel %vm1645_vm11, %v1644_v19, %v1632_v38 }
0x270d   :  { %v1608_v7 = vadd.f32 %v1607_v2, %v1599_v62 }
0x270f   :  { %v1609_v10 = vsub.f32 %v1593_v59, %v1608_v7 }
0x2711   :  { %1635 = vrot.lane.b32.xlu1 %v1609_v10, %s2345_s25 }
0x2783   :  { %v1636_v40 = vpop.permute.xlu1 %1635 }
0x2784   :  { %v1648_v57 = vsel %vm1647_vm12, %v1646_v20, %v1636_v40 }
0x2785   :  { %1649 = vst [vmem:[#allocation5] sm:$0x3] %v1648_v57 }
0x2786   :  { %2319 = shalt.err (!%p2316_p12)
}
0x2787   :  { %s2320_s30 = scalar_lea.hbm %s2739_s3, 32 }
0x2788   :  { %p2321_p13 = scmp.ne.s32.totalorder %s2739_s3, %s2320_s30  ;;  %p2324_p0 = scmp.lt.u32.totalorder %s2320_s30, %s2739_s3 }
0x278a   :  { %p2326_p1 = pnand %p2324_p0, %p2321_p13 }
0x278c   :  { %2329 = shalt.err (!%p2326_p1)
}
0x278d   :  { %1659 = dma.vmem_to_hbm [thread:$0]  %s1657_s27, 32, %s2739_s3, [#allocation4]  }
0x278e   :  { %2332 = dma.done.wait [#allocation4], 32  }
0x278f   :  { %2333 = vsyncadd [#allocation4], 4294967264 }
0x2790   :  { %1663 = vsyncpa [#allocation3], 1 }
0x2791   :  { %1664 = vsyncpa [#allocation4], 1 }

</bundles_post_ra>
